<compile_context>
chip_gen: v7x
topology: tpu7x:2x2x1
jax: 0.10.0
libtpu: 0.0.40
codegen_flags: <defaults>
</compile_context>

<pallas_src>
import jax
import jax.numpy as jnp
from jax.experimental import pallas as pl
from jax.experimental.pallas import tpu as pltpu


# ----------------------------- Pallas kernel ------------------------------ #
def _fused_matmul_kernel(x_ref, w_ref, o_ref):
    # x_ref: (tile_q, W_in)   folded input windows (2 adjacent s-blocks, C_in ch)
    # w_ref: (W_in, s*A)      block-Toeplitz fused conv+dense weight (VMEM resident)
    # o_ref: (tile_q, s*A)    s output rows per folded row, fully lane-dense
    o_ref[...] = jnp.dot(
        x_ref[...], w_ref[...], preferred_element_type=jnp.float32
    ).astype(o_ref.dtype)


# ------------------------------ static helpers ---------------------------- #
def _ceil_div(a, b):
    return -(-a // b)


def _round_up(x, m):
    return _ceil_div(x, m) * m


def _pick_fold(T, K):
    """Fold factor s: multiple of 8 with s >= K-1 (window spans <= 2 blocks).
    Prefer an s that divides T so no tail rows / post-slice are needed."""
    s_min = max(8, _round_up(max(K - 1, 1), 8))
    for s in range(s_min, min(4 * s_min, 256) + 1, 8):
        if T % s == 0:
            return s
    return s_min


def _pick_tile_q(n_q, s, a, itemsize):
    """Folded rows per grid step: multiple of 8 (or the full extent), ~2 MiB of
    output per step, and >= 2 grid steps whenever possible (v7x megacore)."""
    if n_q <= 8:
        return n_q                      # tiny problem: one full block (legal: == full dim)
    cap = max(8, ((2 * 1024 * 1024) // (s * a * itemsize)) // 8 * 8)
    half = max(8, (n_q // 2) // 8 * 8)  # guarantees >= 2 grid steps
    return min(cap, half)


# ------------------------------ forward wrapper ---------------------------- #
@jax.jit
def location_layer_forward(attention_weights_cat, conv_w, dense_w):
    """attention_weights_cat: (B, 2, T)  [PyTorch NCL layout]
       conv_w:  (F, 2, K)   Conv1d weight (out_ch, in_ch, kernel), no bias
       dense_w: (A, F)      Linear weight (out_dim, in_dim), no bias
       returns: (B, T, A)
    """
    B, C_in, T = attention_weights_cat.shape
    F_filters, _, K = conv_w.shape
    A, _ = dense_w.shape
    assert K % 2 == 1, "LocationLayer assumes an odd conv kernel size"
    pad = (K - 1) // 2
    dtype = attention_weights_cat.dtype

    # Static tiling parameters (all derived from static shapes).
    s = _pick_fold(T, K)                      # output rows folded per block
    nb = 1 + _ceil_div(K - 1, s)              # input blocks per window (2 for K > 1)
    T_blocks = _ceil_div(T, s)
    T_padded = (T_blocks + nb - 1) * s
    W_in = nb * s * C_in

    # ---- folded input windows: tiny stream, ~2x the raw 8 B/row input ----
    x_t = jnp.transpose(attention_weights_cat, (0, 2, 1))            # (B, T, C_in)
    x_p = jnp.pad(x_t, ((0, 0), (pad, T_padded - T - pad), (0, 0)))  # conv halo + block pad
    x_blk = x_p.reshape(B, T_blocks + nb - 1, s * C_in)
    xw = jnp.concatenate([x_blk[:, j:j + T_blocks, :] for j in range(nb)], axis=2)
    xw = xw.reshape(B * T_blocks, W_in)                               # (N_q, W_in)

    # ---- block-Toeplitz fused conv+dense weight (built once, VMEM resident) ----
    # W_fused[k, c, a] = sum_f conv_w[f, c, k] * dense_w[a, f]
    w_fused = jnp.einsum("fck,af->kca",
                         conv_w.astype(jnp.float32),
                         dense_w.astype(jnp.float32))                 # (K, C_in, A)
    # W_big[(p, c), (r, a)] = W_fused[p - r, c, a] if 0 <= p - r < K else 0
    p_idx = jnp.arange(nb * s)[:, None]                               # window position
    r_idx = jnp.arange(s)[None, :]                                    # row within block
    k_idx = p_idx - r_idx                                             # conv tap
    valid = (k_idx >= 0) & (k_idx < K)
    w_gather = w_fused[jnp.clip(k_idx, 0, K - 1)]                     # (nb*s, s, C_in, A)
    w_gather = jnp.where(valid[:, :, None, None], w_gather, 0.0)
    w_big = jnp.transpose(w_gather, (0, 2, 1, 3)).reshape(W_in, s * A).astype(dtype)

    # ---- one lane-dense matmul kernel over large row tiles ----
    N_q = B * T_blocks
    tile_q = _pick_tile_q(N_q, s, A, jnp.dtype(dtype).itemsize)
    grid = (_ceil_div(N_q, tile_q),)

    out_folded = pl.pallas_call(
        _fused_matmul_kernel,
        out_shape=jax.ShapeDtypeStruct((N_q, s * A), dtype),
        grid_spec=pltpu.PrefetchScalarGridSpec(
            num_scalar_prefetch=0,
            grid=grid,
            in_specs=[
                pl.BlockSpec((tile_q, W_in), lambda i: (i, 0)),
                pl.BlockSpec((W_in, s * A), lambda i: (0, 0)),   # weight stays resident
            ],
            out_specs=pl.BlockSpec((tile_q, s * A), lambda i: (i, 0)),
        ),
        compiler_params=pltpu.CompilerParams(
            dimension_semantics=("parallel",)),
    )(xw, w_big)

    # Row-major reshape is free (no data movement); a tail slice only triggers
    # when no fold s divides T (one output-sized copy in that rare case).
    out = out_folded.reshape(B, T_blocks * s, A)
    if T_blocks * s != T:
        out = out[:, :T, :]
    return out


# ------------------------------ test harness ------------------------------ #
def _xavier_uniform(key, shape, fan_in, fan_out, gain):
    bound = gain * jnp.sqrt(6.0 / (fan_in + fan_out))
    return jax.random.uniform(key, shape, jnp.float32, -bound, bound)


def _reference(attention_weights_cat, conv_w, dense_w):
    """Plain-JAX reference matching PyTorch LocationLayer.forward."""
    pad = (conv_w.shape[2] - 1) // 2
    conv = jax.lax.conv_general_dilated(
        attention_weights_cat, conv_w,
        window_strides=(1,), padding=[(pad, pad)],
        dimension_numbers=("NCH", "OIH", "NCH"))
    proc = jnp.transpose(conv, (0, 2, 1))        # (B, T, F)
    return proc @ dense_w.T                      # (B, T, A)


if __name__ == "__main__":
    key = jax.random.PRNGKey(0)
    k_x, k_conv, k_dense, k_x2, k_c2, k_d2 = jax.random.split(key, 6)

    # Config 1: small shapes, T divisible by the fold -> pure kernel path,
    # grid of 2 parallel steps (exercises the multi-TensorCore path on v7x).
    B, T = 2, 64
    attention_n_filters = 8
    attention_kernel_size = 5
    attention_dim = 32

    x = jax.random.normal(k_x, (B, 2, T), jnp.float32)
    fan_in_c = 2 * attention_kernel_size
    fan_out_c = attention_n_filters * attention_kernel_size
    conv_w = _xavier_uniform(k_conv, (attention_n_filters, 2, attention_kernel_size),
                             fan_in_c, fan_out_c, gain=1.0)
    dense_w = _xavier_uniform(k_dense, (attention_dim, attention_n_filters),
                              attention_n_filters, attention_dim, gain=5.0 / 3.0)

    out = jax.block_until_ready(location_layer_forward(x, conv_w, dense_w))
    ref = _reference(x, conv_w, dense_w)
    assert out.shape == (B, T, attention_dim)
    assert jnp.allclose(out, ref, atol=1e-4, rtol=1e-4), "mismatch vs reference"

    # Config 2: T not a multiple of the fold -> exercises the tail-slice path.
    B2, T2, K2, F2, A2 = 2, 20, 5, 4, 16
    x2 = jax.random.normal(k_x2, (B2, 2, T2), jnp.float32)
    conv_w2 = _xavier_uniform(k_c2, (F2, 2, K2), 2 * K2, F2 * K2, gain=1.0)
    dense_w2 = _xavier_uniform(k_d2, (A2, F2), F2, A2, gain=5.0 / 3.0)
    out2 = jax.block_until_ready(location_layer_forward(x2, conv_w2, dense_w2))
    ref2 = _reference(x2, conv_w2, dense_w2)
    assert out2.shape == (B2, T2, A2)
    assert jnp.allclose(out2, ref2, atol=1e-4, rtol=1e-4), "mismatch vs reference (tail)"

    print("KERNEL_OK")
</pallas_src>

<mosaic_0001>
module attributes {stable_mosaic.version = 11 : i64} {
  func.func @_fused_matmul_kernel(%arg0: i32, %arg1: memref<8x32xf32, #tpu.memory_space<vmem>>, %arg2: memref<32x256xf32, #tpu.memory_space<vmem>>, %arg3: memref<8x256xf32, #tpu.memory_space<vmem>>) attributes {dimension_semantics = [#tpu.dimension_semantics<parallel>], iteration_bounds = array<i64: 2>, scalar_prefetch = 0 : i64, scratch_operands = 0 : i64, tpu.core_type = #tpu.core_type<tc>, window_params = [{transform_indices = @transform_0, window_bounds = array<i64: 8, 32>}, {pipeline_mode = #tpu.pipeline_mode<synchronous>, transform_indices = @transform_1, window_bounds = array<i64: 32, 256>}, {transform_indices = @transform_2, window_bounds = array<i64: 8, 256>}]} {
    %c0 = arith.constant 0 : index
    %c0_0 = arith.constant 0 : index
    %0 = vector.load %arg1[%c0, %c0_0] : memref<8x32xf32, #tpu.memory_space<vmem>>, vector<8x32xf32>
    %c0_1 = arith.constant 0 : index
    %c0_2 = arith.constant 0 : index
    %1 = vector.load %arg2[%c0_1, %c0_2] : memref<32x256xf32, #tpu.memory_space<vmem>>, vector<32x256xf32>
    %cst = arith.constant dense<0.000000e+00> : vector<8x256xf32>
    %2 = tpu.matmul %0, %1, %cst {dimension_numbers = #tpu.dot_dimension_numbers<[1], [0], [0], [1], [0, 0, 1, 1], [], []>} : vector<8x32xf32>, vector<32x256xf32>, vector<8x256xf32> -> vector<8x256xf32>
    %c0_3 = arith.constant 0 : index
    %c0_4 = arith.constant 0 : index
    %3 = vector.load %arg3[%c0_3, %c0_4] : memref<8x256xf32, #tpu.memory_space<vmem>>, vector<8x256xf32>
    tpu.vector_store %arg3[%c0_3, %c0_4], %2 {strides = array<i32>} : memref<8x256xf32, #tpu.memory_space<vmem>>, vector<8x256xf32>,
    return
  }
  func.func @transform_0(%arg0: i32) -> (i32, i32) {
    %c0_i32 = arith.constant 0 : i32
    %c0_i32_0 = arith.constant 0 : i32
    return %arg0, %c0_i32 : i32, i32
  }
  func.func @transform_1(%arg0: i32) -> (i32, i32) {
    %c0_i32 = arith.constant 0 : i32
    %c0_i32_0 = arith.constant 0 : i32
    %c0_i32_1 = arith.constant 0 : i32
    return %c0_i32, %c0_i32_0 : i32, i32
  }
  func.func @transform_2(%arg0: i32) -> (i32, i32) {
    %c0_i32 = arith.constant 0 : i32
    %c0_i32_0 = arith.constant 0 : i32
    return %arg0, %c0_i32 : i32, i32
  }
}

</mosaic_0001>

<bundles_post_ra>
// kernel: location_layer_forward.1
= control target key start
LH: loop header
LB: loop body
LE: loop exit
PB: predicated region body
PF: predicated region fallthrough
CT: control target
= control target key end

     0   :  { %s335_s9 = smov 0   ;;  %s376_s0 = inlined_call_operand.vmem [shape: f32[16,32], index: 0, kind: input, shape index: {}]   ;;  %s377_s1 = inlined_call_operand.vmem [shape: f32[32,256], index: 1, kind: input, shape index: {}]   ;;  %s378_s2 = inlined_call_operand.vmem [shape: f32[16,256], index: 2, kind: output, shape index: {}]  }
   0x1 LB: > { %s282_s10 = sadd.s32 4294967295, %s317_s9   ;;  %p286_p0 = scmp.ge.s32.totalorder %s317_s9, 1  ;;  %s317_s9 = sphi %s335_s9, %s12_s9  }
   0x2   : > { %p111_p1 = scmp.lt.s32.totalorder %s317_s9, 3 }
   0x4   : > { %p112_p2 = pnand %p286_p0, %p111_p1 }
   0x5   : > { %v143_v0 = vld [vmem:[%s377_s1 + $0x8] sm:$0xff] (!%p112_p2)  ;;  %v145_v1 = vld [vmem:[%s377_s1 + $0x18] sm:$0xff] (!%p112_p2)  ;;  %v142_v2 = vld [vmem:[%s377_s1] sm:$0xff] (!%p112_p2)  ;;  %p132_p3 = scmp.lt.s32.totalorder (!%p112_p2), %s282_s10, 1  ;;  %v319_v7 = vmov (!%p112_p2), 0.0   ;;  %vm150_vm0 = vcmask (!%p112_p2), 261120  }
   0x6   : > { %115 = sbr.rel (%p112_p2) target bundleno = 231 (0xe7), region = 28  ;;  %v294_v3 = vpack.c.bf16 (!%p112_p2), %v145_v1, %v143_v0  ;;  %v144_v4 = vld [vmem:[%s377_s1 + $0x10] sm:$0xff] (!%p112_p2)  ;;  %v147_v5 = vld [vmem:[%s377_s1 + $0x28] sm:$0xff] (!%p112_p2)  ;;  %v149_v6 = vld [vmem:[%s377_s1 + $0x38] sm:$0xff] (!%p112_p2)  ;;  %218 = vmatprep.mubr.f32.mxu0 (!%p112_p2), %v319_v7 }
   0x7   : > { %v296_v8 = vpack.c.bf16 (!%p112_p2), %v144_v4, %v142_v2  ;;  %v298_v9 = vpack.c.bf16 (!%p112_p2), %v149_v6, %v147_v5  ;;  %v146_v10 = vld [vmem:[%s377_s1 + $0x20] sm:$0xff] (!%p112_p2)  ;;  %v148_v11 = vld [vmem:[%s377_s1 + $0x30] sm:$0xff] (!%p112_p2) }
   0x8   : > { %295 = vmatprep.subr.bf16.mxu0 (!%p112_p2), %v294_v3  ;;  %v300_v12 = vpack.c.bf16 (!%p112_p2), %v148_v11, %v146_v10 }
   0x9   : > { %297 = vmatpush1.bf16.msra.mxu0 (!%p112_p2), %v296_v8 }
   0xa   : > { %299 = vmatprep.subr.bf16.mxu0 (!%p112_p2), %v298_v9 }
   0xd   : > { %s380_s10 = smov (!%p132_p3, %s282_s10), 1  ;;  %301 = vmatpush1.bf16.msra.mxu0 %v300_v12 }
   0xe   : > { %s287_s27 = sshll.u32 %s380_s10, 3  ;;  %s293_s3 = sshll.u32 %s380_s10, 4 }
   0xf   : > { %s135_s30 = scalar_lea.vmem %s376_s0, %s287_s27  ;;  %s140_s6 = scalar_lea.vmem %s378_s2, %s293_s3 }
  0x10   : > { %v141_v13 = vld [vmem:[%s135_s30] sm:$0xff] }
  0x11   : > { %290 = vmatmul.mubr.msk.f32.vlgmr.msra.gmra.mrb[0].mxu0 %vm150_vm0, %v141_v13 }
  0xe4   : > { %v220_v14 = vpop.f32.mrb[0].mxu0 }
  0xe5   : > { %225 = vst [vmem:[%s140_s6] sm:$0xff] %v220_v14  ;;  %v222_v15 = vpop.f32.mrb[1].mxu0 }
  0xe6   : > { %226 = vst [vmem:[%s140_s6 + $0x8] sm:$0xff] %v222_v15 }
  0xe7 PF: > { %s12_s9 = sadd.s32 1, %s317_s9  }
  0xe8   : > { %p9_p4 = scmp.ge.s32.totalorder %s12_s9, 4  }
  0xea   :  { %11 = sbr.rel (!%p9_p4) target bundleno = 1 (0x1), region = 58 }

</bundles_post_ra>
